<compile_context>
chip_gen: v5e
topology: v5e:2x2
jax: 0.10.0
libtpu: 0.0.40
codegen_flags: <defaults>
</compile_context>

<pallas_src>
import functools

import jax
import jax.numpy as jnp
from jax.experimental import pallas as pl
from jax.experimental.pallas import tpu as pltpu


def _vmem_limit_bytes():
    # Generation-aware scoped-VMEM cap: half of physical VMEM
    # (v5e/v6e: 64 MiB, v7x: 32 MiB) so double-buffered pipelines never hit
    # the hard ceiling; falls back to the 32 MiB default if the query fails.
    try:
        return min(64 * 1024 * 1024,
                   int(pltpu.get_tpu_info().vmem_capacity_bytes) // 2)
    except Exception:
        return 32 * 1024 * 1024


# ----------------------------------------------------------------------------
# Kernel 1: fused KAGNConv2D(kernel_size=1, degree=D) + InstanceNorm + SiLU
#           + residual + 1x1 conv + LeakyReLU(0.2).
#           One (branch, batch) tile per grid step, grid=(3, B) "parallel".
# ----------------------------------------------------------------------------
def _kagn_branch_kernel(x_ref, w_ref, b0_ref, wc_ref, beta_ref, o_ref, *, ndeg):
    r = pl.program_id(0)                      # branch index (c / h / w)
    x = x_ref[0, 0]                           # (C, HW)  f32, one batch element
    hw = x.shape[1]
    inv_hw = 1.0 / float(hw)

    # Per-degree accumulation (no (K, HW) basis buffer): degree-block 0 of the
    # packed weight slab is base_conv (applied to silu(x)); blocks 1..D are the
    # poly_conv degree blocks (applied to silu(p_d)); the degree-0 Gram term
    # (silu(ones) == const) is folded into the precomputed bias b0.
    # MXU operands in bf16, accumulation in f32.
    s = b0_ref[0] + jnp.dot(w_ref[0, 0], jax.nn.silu(x).astype(jnp.bfloat16),
                            preferred_element_type=jnp.float32)
    t = jnp.tanh(x)                           # Gram recurrence stays in f32
    p_prev = jnp.ones_like(t)
    p_cur = t
    for d in range(1, ndeg):                  # poly degrees 1..D, static unroll
        s = s + jnp.dot(w_ref[0, d], jax.nn.silu(p_cur).astype(jnp.bfloat16),
                        preferred_element_type=jnp.float32)
        if d + 1 < ndeg:
            p_next = t * p_cur - beta_ref[r, d + 1] * p_prev
            p_prev, p_cur = p_cur, p_next

    # InstanceNorm2d(affine=False, eps=1e-5): this tile is exactly one
    # (batch, branch), so the stats are plain lane reductions (XLU), in f32.
    mu = jnp.sum(s, axis=-1, keepdims=True) * inv_hw
    ex2 = jnp.sum(s * s, axis=-1, keepdims=True) * inv_hw
    var = jnp.maximum(ex2 - mu * mu, 0.0)
    inv_std = jax.lax.rsqrt(var + 1e-5)
    kag = jax.nn.silu((s - mu) * inv_std)

    # GKAN glue: residual + 1x1 conv (no bias) + LeakyReLU(0.2).
    z = jnp.dot(wc_ref[0], (kag + x).astype(jnp.bfloat16),
                preferred_element_type=jnp.float32)
    o_ref[0, 0] = jnp.where(z > 0, z, 0.2 * z).astype(o_ref.dtype)


def kagn_branches(xs, w_stack, bias0, wc, betas):
    """xs: (3, B, C, HW) f32 -> (3, B, C, HW) bf16 branch outputs."""
    nb, nbatch, C, HW = xs.shape
    ndeg = w_stack.shape[1]
    # TODO(synk): at production HW (e.g. 64*64) additionally tile HW and merge
    # InstanceNorm stats across sub-tiles (two-pass / Welford) if a per-batch
    # tile ever exceeds the VMEM budget; per-batch tiles fit comfortably here.
    ce = pl.CostEstimate(
        flops=int(nb * nbatch * 2 * C * C * HW * (ndeg + 1)),
        transcendentals=int(nb * nbatch * C * HW * (ndeg + 3)),
        bytes_accessed=int(nb * nbatch * C * HW * (4 + 2)
                           + nb * 2 * (ndeg + 1) * C * C),
    )
    return pl.pallas_call(
        functools.partial(_kagn_branch_kernel, ndeg=ndeg),
        out_shape=jax.ShapeDtypeStruct((nb, nbatch, C, HW), jnp.bfloat16),
        grid_spec=pltpu.PrefetchScalarGridSpec(
            num_scalar_prefetch=0,
            grid=(nb, nbatch),        # 3*B even steps -> v7x megacore balance
            in_specs=[
                pl.BlockSpec((1, 1, C, HW), lambda r, b: (r, b, 0, 0)),    # x
                pl.BlockSpec((1, ndeg, C, C), lambda r, b: (r, 0, 0, 0)),  # degree slab
                pl.BlockSpec((1, C, 1), lambda r, b: (r, 0, 0)),           # deg-0 bias
                pl.BlockSpec((1, C, C), lambda r, b: (r, 0, 0)),           # conv_{c,h,w}
                pl.BlockSpec(memory_space=pltpu.MemorySpace.SMEM),         # betas (3,D+1)
            ],
            out_specs=pl.BlockSpec((1, 1, C, HW), lambda r, b: (r, b, 0, 0)),
        ),
        compiler_params=pltpu.CompilerParams(
            dimension_semantics=("parallel", "parallel"),
            vmem_limit_bytes=_vmem_limit_bytes()),
        cost_estimate=ce,
    )(xs, w_stack, bias0, wc, betas)


# ----------------------------------------------------------------------------
# Kernel 2: final Conv2d(3C -> C, 3x3, padding=1, bias=True).
# Per batch element: the padded plane is flattened to a 128-aligned lane row
# with a halo margin; the 9 taps are static lane-shifted views accumulated via
# 9 K=3C matmuls into one f32 accumulator (no im2col buffer).
# ----------------------------------------------------------------------------
def _conv3x3_kernel(xe_ref, w_ref, b_ref, o_ref, *, wp_pad, margin):
    C, lanes = o_ref.shape[1], o_ref.shape[2]
    xe = xe_ref[0]                                       # (3C, Lp) bf16
    acc = jnp.zeros((C, lanes), jnp.float32)
    # TODO(synk): on v5e, replace the lane-unaligned slices with Wp padded to a
    # multiple of 128 + pltpu.roll for the dx shifts (single vst slot there).
    for dy in range(3):
        for dx in range(3):
            a = margin + (dy - 1) * wp_pad + (dx - 1)    # static lane offset
            acc = acc + jnp.dot(w_ref[dy * 3 + dx], xe[:, a:a + lanes],
                                preferred_element_type=jnp.float32)
    o_ref[0] = acc + b_ref[...]


def final_conv3x3(o_all, w, bias):
    """o_all: (B, 3C, H, W) bf16;  w: (C, 3C, 3, 3);  bias: (C,) -> (B,C,H,W) f32."""
    B, C3, H, W = o_all.shape
    C = w.shape[0]
    Hp, Wp = H + 2, W + 2
    Lb = pl.cdiv(Hp * Wp, 128) * 128       # 128-aligned per-batch lane row
    margin = Wp + 1                        # halo >= max |tap shift|
    # Halo-trick validity: all wrapped / out-of-row taps land only on output
    # positions discarded by the final [1:1+H, 1:1+W] crop.
    assert margin >= Wp + 1 and Lb >= Hp * Wp

    xp = jnp.pad(o_all, ((0, 0), (0, 0), (1, 1), (1, 1)))          # (B,3C,Hp,Wp)
    xf = xp.reshape(B, C3, Hp * Wp)
    xf = jnp.pad(xf, ((0, 0), (0, 0), (margin, margin + Lb - Hp * Wp)))
    xf = xf.astype(jnp.bfloat16)
    Lp = Lb + 2 * margin
    w_taps = jnp.transpose(w, (2, 3, 0, 1)).reshape(9, C, C3).astype(jnp.bfloat16)
    b2 = bias.reshape(C, 1).astype(jnp.float32)

    # TODO(synk): at production sizes tile Lb by image rows (grid=(B, n_row_tiles))
    # for v7x megacore balance with odd B and to bound the per-step working set.
    kern = functools.partial(_conv3x3_kernel, wp_pad=Wp, margin=margin)
    ce = pl.CostEstimate(
        flops=int(B * 2 * C * C3 * 9 * Lb),
        transcendentals=0,
        bytes_accessed=int(B * (C3 * Lp * 2 + C * Lb * 4) + 9 * C * C3 * 2),
    )
    outf = pl.pallas_call(
        kern,
        out_shape=jax.ShapeDtypeStruct((B, C, Lb), jnp.float32),
        grid_spec=pltpu.PrefetchScalarGridSpec(
            num_scalar_prefetch=0,
            grid=(B,),
            in_specs=[
                pl.BlockSpec((1, C3, Lp), lambda b: (b, 0, 0)),
                pl.BlockSpec((9, C, C3), lambda b: (0, 0, 0)),
                pl.BlockSpec((C, 1), lambda b: (0, 0)),
            ],
            out_specs=pl.BlockSpec((1, C, Lb), lambda b: (b, 0, 0)),
        ),
        compiler_params=pltpu.CompilerParams(
            dimension_semantics=("parallel",),
            vmem_limit_bytes=_vmem_limit_bytes()),
        cost_estimate=ce,
    )(xf, w_taps, b2)
    return outf[:, :, :Hp * Wp].reshape(B, C, Hp, Wp)[:, :, 1:1 + H, 1:1 + W]


# ----------------------------------------------------------------------------
# GKAN forward (Pallas) and a pure-JAX reference
# ----------------------------------------------------------------------------
def _pack_branch(wb, wp, betas, wc):
    C = wb.shape[0]
    ndeg = wp.shape[1] // C                          # D + 1
    # Degree-0 Gram term: silu(ones) is a constant -> fold into a bias.
    bias0 = (jax.nn.silu(jnp.float32(1.0))
             * jnp.sum(wp[:, :C], axis=1)).reshape(C, 1)
    # Degree-block weight slab: block 0 = base_conv, block d = poly degree d.
    w_stack = jnp.stack(
        [wb] + [wp[:, d * C:(d + 1) * C] for d in range(1, ndeg)], axis=0)
    return w_stack, bias0, wc, betas


def gkan_forward(x_in, params):
    B, d1, d2, d3 = x_in.shape
    assert d1 == d2 == d3, "GKAN.forward is only shape-consistent when C==H==W"
    N = d1
    HW = N * N

    # Branch inputs in (branch, batch, channel, H*W) layout.
    # TODO(synk): at production sizes these input transposes and the output
    # permutations below should move in-kernel (per-branch XLU transposes /
    # transposed index_maps) to avoid the extra HBM activation copies.
    x_c = x_in.reshape(B, N, HW)                                  # (B, d1, d2*d3)
    x_h = jnp.transpose(x_in, (0, 3, 2, 1)).reshape(B, N, HW)     # (B, d3, d2*d1)
    x_w = jnp.transpose(x_in, (0, 2, 1, 3)).reshape(B, N, HW)     # (B, d2, d1*d3)
    xs = jnp.stack([x_c, x_h, x_w], axis=0)                       # (3, B, N, HW)

    packs = [_pack_branch(*params[k]) for k in ("c", "h", "w")]
    w_stack = jnp.stack([p[0] for p in packs], 0).astype(jnp.bfloat16)  # (3,D+1,C,C)
    bias0 = jnp.stack([p[1] for p in packs], 0)                         # (3,C,1) f32
    wc = jnp.stack([p[2] for p in packs], 0).astype(jnp.bfloat16)       # (3,C,C)
    betas = jnp.stack([p[3] for p in packs], 0)                         # (3,D+1) f32

    outs = kagn_branches(xs, w_stack, bias0, wc, betas)           # (3,B,N,HW) bf16
    o = outs.reshape(3, B, N, N, N)
    vec_c = jnp.transpose(o[0], (0, 1, 3, 2))     # (B,d1,d2,d3) -> (B,d1,d3,d2)
    vec_h = jnp.transpose(o[1], (0, 3, 2, 1))     # (B,d3,d2,d1) -> (B,d1,d2,d3)
    vec_w = jnp.transpose(o[2], (0, 2, 1, 3))     # (B,d2,d1,d3) -> (B,d1,d2,d3)
    o_all = jnp.concatenate([vec_c, vec_h, vec_w], axis=1)        # (B,3N,N,N) bf16
    return final_conv3x3(o_all, params["conv_w"], params["conv_b"])


def _ref_kagn_branch(x, wb, wp, betas, wc):
    D = betas.shape[0] - 1
    basis = jnp.einsum("oi,bihw->bohw", wb, jax.nn.silu(x))
    t = jnp.tanh(x)
    ps = [jnp.ones_like(t), t]
    for i in range(2, D + 1):
        ps.append(t * ps[-1] - betas[i] * ps[-2])
    g = jnp.concatenate(ps[:D + 1], axis=1)          # degree-major, like wp
    y = jnp.einsum("oi,bihw->bohw", wp, jax.nn.silu(g))
    s = y + basis
    mu = jnp.mean(s, axis=(2, 3), keepdims=True)
    var = jnp.mean((s - mu) ** 2, axis=(2, 3), keepdims=True)
    kag = jax.nn.silu((s - mu) / jnp.sqrt(var + 1e-5))
    z = jnp.einsum("oi,bihw->bohw", wc, kag + x)
    return jnp.where(z > 0, z, 0.2 * z)


def gkan_ref(x_in, params):
    x_c = x_in
    x_w = jnp.transpose(x_in, (0, 2, 1, 3))
    x_h = jnp.transpose(x_in, (0, 3, 2, 1))
    out_c = _ref_kagn_branch(x_c, *params["c"])
    out_h = _ref_kagn_branch(x_h, *params["h"])
    out_w = _ref_kagn_branch(x_w, *params["w"])
    vec_c = jnp.transpose(out_c, (0, 1, 3, 2))
    vec_h = jnp.transpose(out_h, (0, 3, 2, 1))
    vec_w = jnp.transpose(out_w, (0, 2, 1, 3))
    o_all = jnp.concatenate([vec_c, vec_h, vec_w], axis=1)
    out = jax.lax.conv_general_dilated(
        o_all, params["conv_w"], (1, 1), ((1, 1), (1, 1)),
        dimension_numbers=("NCHW", "OIHW", "NCHW"))
    return out + params["conv_b"].reshape(1, -1, 1, 1)


# ----------------------------------------------------------------------------
# Deterministic parameter init (shapes from GKAN.__init__, degree=3, k=1)
# ----------------------------------------------------------------------------
def gram_beta_coeffs(beta_weights, degree):
    # beta(n, m) = (m+n)(m-n) n^2 (4n^2-1) / m^2 * beta_weights[n], n=i-1, m=i
    betas = jnp.zeros((degree + 1,), jnp.float32)
    for i in range(2, degree + 1):
        n, m = i - 1, i
        coef = (m + n) * (m - n) * n * n * (4.0 * n * n - 1.0) / (m * m)
        betas = betas.at[i].set(coef * beta_weights[n])
    return betas


def _kaiming_uniform(key, shape, fan_in):
    bound = (3.0 / fan_in) ** 0.5
    return jax.random.uniform(key, shape, jnp.float32, -bound, bound)


if __name__ == "__main__":
    B, N, DEG = 2, 8, 3          # c_in == w_in == h_in == N (required by forward)
    key = jax.random.PRNGKey(0)
    kx, kp = jax.random.split(key)
    x_in = jax.random.normal(kx, (B, N, N, N), jnp.float32)

    params = {}
    branch_keys = jax.random.split(kp, 4)
    for bk, name in zip(branch_keys[:3], ("c", "h", "w")):
        k1, k2, k3, k4 = jax.random.split(bk, 4)
        wb = _kaiming_uniform(k1, (N, N), N)                          # base_conv 1x1
        wp = _kaiming_uniform(k2, (N, N * (DEG + 1)), N * (DEG + 1))  # poly_conv 1x1
        bw = jax.random.normal(k3, (DEG + 1,), jnp.float32) / (N * (DEG + 1.0))
        betas = gram_beta_coeffs(bw, DEG)
        wc = _kaiming_uniform(k4, (N, N), N)                          # conv_{c,h,w}
        params[name] = (wb, wp, betas, wc)
    kf1, kf2 = jax.random.split(branch_keys[3])
    params["conv_w"] = _kaiming_uniform(kf1, (N, 3 * N, 3, 3), 3 * N * 9)
    params["conv_b"] = jax.random.uniform(kf2, (N,), jnp.float32, -0.1, 0.1)

    out = jax.block_until_ready(jax.jit(gkan_forward)(x_in, params))
    ref = jax.block_until_ready(gkan_ref(x_in, params))

    assert out.shape == (B, N, N, N), out.shape
    # bf16 MXU operands with f32 accumulation -> looser tolerance than pure f32.
    max_err = float(jnp.max(jnp.abs(out - ref)))
    rel_err = float(jnp.linalg.norm((out - ref).ravel())
                    / jnp.linalg.norm(ref.ravel()))
    assert max_err < 1.5e-1 and rel_err < 3e-2, (max_err, rel_err)
    print("KERNEL_OK")
</pallas_src>

<mosaic_0001>
module attributes {stable_mosaic.version = 11 : i64} {
  func.func @_kagn_branch_kernel(%arg0: i32, %arg1: i32, %arg2: memref<1x1x8x64xf32, #tpu.memory_space<vmem>>, %arg3: memref<1x4x8x8xbf16, #tpu.memory_space<vmem>>, %arg4: memref<1x8x1xf32, #tpu.memory_space<vmem>>, %arg5: memref<1x8x8xbf16, #tpu.memory_space<vmem>>, %arg6: memref<3x4xf32, #tpu.memory_space<smem>>, %arg7: memref<1x1x8x64xbf16, #tpu.memory_space<vmem>>) attributes {dimension_semantics = [#tpu.dimension_semantics<parallel>, #tpu.dimension_semantics<parallel>], iteration_bounds = array<i64: 3, 2>, scalar_prefetch = 0 : i64, scratch_operands = 0 : i64, tpu.core_type = #tpu.core_type<tc>, window_params = [{transform_indices = @transform_0, window_bounds = array<i64: 1, 1, 8, 64>}, {transform_indices = @transform_1, window_bounds = array<i64: 1, 4, 8, 8>}, {transform_indices = @transform_2, window_bounds = array<i64: 1, 8, 1>}, {transform_indices = @transform_3, window_bounds = array<i64: 1, 8, 8>}, {transform_indices = @transform_4, window_bounds = array<i64: 3, 4>}, {transform_indices = @transform_5, window_bounds = array<i64: 1, 1, 8, 64>}]} {
    %c0 = arith.constant 0 : index
    %c0_0 = arith.constant 0 : index
    %c0_1 = arith.constant 0 : index
    %c0_2 = arith.constant 0 : index
    %0 = vector.load %arg2[%c0, %c0_0, %c0_1, %c0_2] : memref<1x1x8x64xf32, #tpu.memory_space<vmem>>, vector<1x1x8x64xf32>
    %1 = vector.shape_cast %0 : vector<1x1x8x64xf32> to vector<8x64xf32>
    %c0_3 = arith.constant 0 : index
    %c0_4 = arith.constant 0 : index
    %c0_5 = arith.constant 0 : index
    %2 = vector.load %arg4[%c0_3, %c0_4, %c0_5] : memref<1x8x1xf32, #tpu.memory_space<vmem>>, vector<1x8x1xf32>
    %3 = vector.shape_cast %2 : vector<1x8x1xf32> to vector<8x1xf32>
    %c0_6 = arith.constant 0 : index
    %c0_7 = arith.constant 0 : index
    %c0_8 = arith.constant 0 : index
    %c0_9 = arith.constant 0 : index
    %4 = vector.load %arg3[%c0_6, %c0_7, %c0_8, %c0_9] : memref<1x4x8x8xbf16, #tpu.memory_space<vmem>>, vector<1x1x8x8xbf16>
    %5 = vector.shape_cast %4 : vector<1x1x8x8xbf16> to vector<8x8xbf16>
    %6 = arith.negf %1 : vector<8x64xf32>
    %7 = math.exp %6 : vector<8x64xf32>
    %cst = arith.constant 1.000000e+00 : f32
    %8 = vector.broadcast %cst : f32 to vector<8x64xf32>
    %9 = arith.addf %8, %7 : vector<8x64xf32>
    %10 = arith.divf %8, %9 : vector<8x64xf32>
    %11 = arith.mulf %1, %10 : vector<8x64xf32>
    %12 = arith.truncf %11 : vector<8x64xf32> to vector<8x64xbf16>
    %cst_10 = arith.constant dense<0.000000e+00> : vector<8x64xf32>
    %13 = tpu.matmul %5, %12, %cst_10 {dimension_numbers = #tpu.dot_dimension_numbers<[1], [0], [0], [1], [0, 0, 1, 1], [], []>} : vector<8x8xbf16>, vector<8x64xbf16>, vector<8x64xf32> -> vector<8x64xf32>
    %14 = vector.broadcast %3 : vector<8x1xf32> to vector<8x64xf32>
    %15 = arith.addf %14, %13 : vector<8x64xf32>
    %16 = math.tanh %1 : vector<8x64xf32>
    %cst_11 = arith.constant 1.000000e+00 : f32
    %17 = vector.broadcast %cst_11 : f32 to vector<8x64xf32>
    %c0_12 = arith.constant 0 : index
    %c1 = arith.constant 1 : index
    %c0_13 = arith.constant 0 : index
    %c0_14 = arith.constant 0 : index
    %18 = vector.load %arg3[%c0_12, %c1, %c0_13, %c0_14] : memref<1x4x8x8xbf16, #tpu.memory_space<vmem>>, vector<1x1x8x8xbf16>
    %19 = vector.shape_cast %18 : vector<1x1x8x8xbf16> to vector<8x8xbf16>
    %20 = arith.negf %16 : vector<8x64xf32>
    %21 = math.exp %20 : vector<8x64xf32>
    %cst_15 = arith.constant 1.000000e+00 : f32
    %22 = vector.broadcast %cst_15 : f32 to vector<8x64xf32>
    %23 = arith.addf %22, %21 : vector<8x64xf32>
    %24 = arith.divf %22, %23 : vector<8x64xf32>
    %25 = arith.mulf %16, %24 : vector<8x64xf32>
    %26 = arith.truncf %25 : vector<8x64xf32> to vector<8x64xbf16>
    %cst_16 = arith.constant dense<0.000000e+00> : vector<8x64xf32>
    %27 = tpu.matmul %19, %26, %cst_16 {dimension_numbers = #tpu.dot_dimension_numbers<[1], [0], [0], [1], [0, 0, 1, 1], [], []>} : vector<8x8xbf16>, vector<8x64xbf16>, vector<8x64xf32> -> vector<8x64xf32>
    %28 = arith.addf %15, %27 : vector<8x64xf32>
    %29 = arith.mulf %16, %16 : vector<8x64xf32>
    %30 = arith.index_cast %arg0 : i32 to index
    %c2 = arith.constant 2 : index
    %31 = memref.load %arg6[%30, %c2] : memref<3x4xf32, #tpu.memory_space<smem>>
    %32 = vector.broadcast %31 : f32 to vector<8x64xf32>
    %33 = arith.mulf %32, %17 : vector<8x64xf32>
    %34 = arith.subf %29, %33 : vector<8x64xf32>
    %c0_17 = arith.constant 0 : index
    %c2_18 = arith.constant 2 : index
    %c0_19 = arith.constant 0 : index
    %c0_20 = arith.constant 0 : index
    %35 = vector.load %arg3[%c0_17, %c2_18, %c0_19, %c0_20] : memref<1x4x8x8xbf16, #tpu.memory_space<vmem>>, vector<1x1x8x8xbf16>
    %36 = vector.shape_cast %35 : vector<1x1x8x8xbf16> to vector<8x8xbf16>
    %37 = arith.negf %34 : vector<8x64xf32>
    %38 = math.exp %37 : vector<8x64xf32>
    %cst_21 = arith.constant 1.000000e+00 : f32
    %39 = vector.broadcast %cst_21 : f32 to vector<8x64xf32>
    %40 = arith.addf %39, %38 : vector<8x64xf32>
    %41 = arith.divf %39, %40 : vector<8x64xf32>
    %42 = arith.mulf %34, %41 : vector<8x64xf32>
    %43 = arith.truncf %42 : vector<8x64xf32> to vector<8x64xbf16>
    %cst_22 = arith.constant dense<0.000000e+00> : vector<8x64xf32>
    %44 = tpu.matmul %36, %43, %cst_22 {dimension_numbers = #tpu.dot_dimension_numbers<[1], [0], [0], [1], [0, 0, 1, 1], [], []>} : vector<8x8xbf16>, vector<8x64xbf16>, vector<8x64xf32> -> vector<8x64xf32>
    %45 = arith.addf %28, %44 : vector<8x64xf32>
    %46 = arith.mulf %16, %34 : vector<8x64xf32>
    %47 = arith.index_cast %arg0 : i32 to index
    %c3 = arith.constant 3 : index
    %48 = memref.load %arg6[%47, %c3] : memref<3x4xf32, #tpu.memory_space<smem>>
    %49 = vector.broadcast %48 : f32 to vector<8x64xf32>
    %50 = arith.mulf %49, %16 : vector<8x64xf32>
    %51 = arith.subf %46, %50 : vector<8x64xf32>
    %c0_23 = arith.constant 0 : index
    %c3_24 = arith.constant 3 : index
    %c0_25 = arith.constant 0 : index
    %c0_26 = arith.constant 0 : index
    %52 = vector.load %arg3[%c0_23, %c3_24, %c0_25, %c0_26] : memref<1x4x8x8xbf16, #tpu.memory_space<vmem>>, vector<1x1x8x8xbf16>
    %53 = vector.shape_cast %52 : vector<1x1x8x8xbf16> to vector<8x8xbf16>
    %54 = arith.negf %51 : vector<8x64xf32>
    %55 = math.exp %54 : vector<8x64xf32>
    %cst_27 = arith.constant 1.000000e+00 : f32
    %56 = vector.broadcast %cst_27 : f32 to vector<8x64xf32>
    %57 = arith.addf %56, %55 : vector<8x64xf32>
    %58 = arith.divf %56, %57 : vector<8x64xf32>
    %59 = arith.mulf %51, %58 : vector<8x64xf32>
    %60 = arith.truncf %59 : vector<8x64xf32> to vector<8x64xbf16>
    %cst_28 = arith.constant dense<0.000000e+00> : vector<8x64xf32>
    %61 = tpu.matmul %53, %60, %cst_28 {dimension_numbers = #tpu.dot_dimension_numbers<[1], [0], [0], [1], [0, 0, 1, 1], [], []>} : vector<8x8xbf16>, vector<8x64xbf16>, vector<8x64xf32> -> vector<8x64xf32>
    %62 = arith.addf %45, %61 : vector<8x64xf32>
    %cst_29 = arith.constant dense<0.000000e+00> : vector<8xf32>
    %63 = vector.multi_reduction <add>, %62, %cst_29 [1] : vector<8x64xf32> to vector<8xf32>
    %64 = vector.shape_cast %63 : vector<8xf32> to vector<8x1xf32>
    %cst_30 = arith.constant 1.562500e-02 : f32
    %65 = vector.broadcast %cst_30 : f32 to vector<8x1xf32>
    %66 = arith.mulf %64, %65 : vector<8x1xf32>
    %67 = arith.mulf %62, %62 : vector<8x64xf32>
    %cst_31 = arith.constant dense<0.000000e+00> : vector<8xf32>
    %68 = vector.multi_reduction <add>, %67, %cst_31 [1] : vector<8x64xf32> to vector<8xf32>
    %69 = vector.shape_cast %68 : vector<8xf32> to vector<8x1xf32>
    %cst_32 = arith.constant 1.562500e-02 : f32
    %70 = vector.broadcast %cst_32 : f32 to vector<8x1xf32>
    %71 = arith.mulf %69, %70 : vector<8x1xf32>
    %72 = arith.mulf %66, %66 : vector<8x1xf32>
    %73 = arith.subf %71, %72 : vector<8x1xf32>
    %cst_33 = arith.constant 0.000000e+00 : f32
    %74 = vector.broadcast %cst_33 : f32 to vector<8x1xf32>
    %75 = arith.maximumf %73, %74 : vector<8x1xf32>
    %cst_34 = arith.constant 9.99999974E-6 : f32
    %76 = vector.broadcast %cst_34 : f32 to vector<8x1xf32>
    %77 = arith.addf %75, %76 : vector<8x1xf32>
    %78 = math.rsqrt %77 : vector<8x1xf32>
    %79 = vector.broadcast %66 : vector<8x1xf32> to vector<8x64xf32>
    %80 = arith.subf %62, %79 : vector<8x64xf32>
    %81 = vector.broadcast %78 : vector<8x1xf32> to vector<8x64xf32>
    %82 = arith.mulf %80, %81 : vector<8x64xf32>
    %83 = arith.negf %82 : vector<8x64xf32>
    %84 = math.exp %83 : vector<8x64xf32>
    %cst_35 = arith.constant 1.000000e+00 : f32
    %85 = vector.broadcast %cst_35 : f32 to vector<8x64xf32>
    %86 = arith.addf %85, %84 : vector<8x64xf32>
    %87 = arith.divf %85, %86 : vector<8x64xf32>
    %88 = arith.mulf %82, %87 : vector<8x64xf32>
    %c0_36 = arith.constant 0 : index
    %c0_37 = arith.constant 0 : index
    %c0_38 = arith.constant 0 : index
    %89 = vector.load %arg5[%c0_36, %c0_37, %c0_38] : memref<1x8x8xbf16, #tpu.memory_space<vmem>>, vector<1x8x8xbf16>
    %90 = vector.shape_cast %89 : vector<1x8x8xbf16> to vector<8x8xbf16>
    %91 = arith.addf %88, %1 : vector<8x64xf32>
    %92 = arith.truncf %91 : vector<8x64xf32> to vector<8x64xbf16>
    %cst_39 = arith.constant dense<0.000000e+00> : vector<8x64xf32>
    %93 = tpu.matmul %90, %92, %cst_39 {dimension_numbers = #tpu.dot_dimension_numbers<[1], [0], [0], [1], [0, 0, 1, 1], [], []>} : vector<8x8xbf16>, vector<8x64xbf16>, vector<8x64xf32> -> vector<8x64xf32>
    %cst_40 = arith.constant 0.000000e+00 : f32
    %94 = vector.broadcast %cst_40 : f32 to vector<8x64xf32>
    %95 = arith.cmpf ogt, %93, %94 : vector<8x64xf32>
    %cst_41 = arith.constant 2.000000e-01 : f32
    %96 = vector.broadcast %cst_41 : f32 to vector<8x64xf32>
    %97 = arith.mulf %96, %93 : vector<8x64xf32>
    %98 = arith.select %95, %93, %97 : vector<8x64xi1>, vector<8x64xf32>
    %99 = arith.truncf %98 : vector<8x64xf32> to vector<8x64xbf16>
    %c0_42 = arith.constant 0 : index
    %c0_43 = arith.constant 0 : index
    %c0_44 = arith.constant 0 : index
    %c0_45 = arith.constant 0 : index
    %100 = vector.load %arg7[%c0_42, %c0_43, %c0_44, %c0_45] : memref<1x1x8x64xbf16, #tpu.memory_space<vmem>>, vector<1x1x8x64xbf16>
    %101 = vector.shape_cast %100 : vector<1x1x8x64xbf16> to vector<8x64xbf16>
    %102 = vector.shape_cast %99 : vector<8x64xbf16> to vector<1x1x8x64xbf16>
    tpu.vector_store %arg7[%c0_42, %c0_43, %c0_44, %c0_45], %102 {strides = array<i32>} : memref<1x1x8x64xbf16, #tpu.memory_space<vmem>>, vector<1x1x8x64xbf16>,
    return
  }
  func.func @transform_0(%arg0: i32, %arg1: i32) -> (i32, i32, i32, i32) {
    %c0_i32 = arith.constant 0 : i32
    %c0_i32_0 = arith.constant 0 : i32
    %c0_i32_1 = arith.constant 0 : i32
    return %arg0, %arg1, %c0_i32, %c0_i32_0 : i32, i32, i32, i32
  }
  func.func @transform_1(%arg0: i32, %arg1: i32) -> (i32, i32, i32, i32) {
    %c0_i32 = arith.constant 0 : i32
    %c0_i32_0 = arith.constant 0 : i32
    %c0_i32_1 = arith.constant 0 : i32
    %c0_i32_2 = arith.constant 0 : i32
    return %arg0, %c0_i32, %c0_i32_0, %c0_i32_1 : i32, i32, i32, i32
  }
  func.func @transform_2(%arg0: i32, %arg1: i32) -> (i32, i32, i32) {
    %c0_i32 = arith.constant 0 : i32
    %c0_i32_0 = arith.constant 0 : i32
    %c0_i32_1 = arith.constant 0 : i32
    return %arg0, %c0_i32, %c0_i32_0 : i32, i32, i32
  }
  func.func @transform_3(%arg0: i32, %arg1: i32) -> (i32, i32, i32) {
    %c0_i32 = arith.constant 0 : i32
    %c0_i32_0 = arith.constant 0 : i32
    %c0_i32_1 = arith.constant 0 : i32
    return %arg0, %c0_i32, %c0_i32_0 : i32, i32, i32
  }
  func.func @transform_4(%arg0: i32, %arg1: i32) -> (i32, i32) {
    %c0_i32 = arith.constant 0 : i32
    %c0_i32_0 = arith.constant 0 : i32
    %c0_i32_1 = arith.constant 0 : i32
    return %c0_i32, %c0_i32_0 : i32, i32
  }
  func.func @transform_5(%arg0: i32, %arg1: i32) -> (i32, i32, i32, i32) {
    %c0_i32 = arith.constant 0 : i32
    %c0_i32_0 = arith.constant 0 : i32
    %c0_i32_1 = arith.constant 0 : i32
    return %arg0, %arg1, %c0_i32, %c0_i32_0 : i32, i32, i32, i32
  }
}

module attributes {stable_mosaic.version = 11 : i64} {
  func.func @_conv3x3_kernel(%arg0: i32, %arg1: memref<1x24x150xbf16, #tpu.memory_space<vmem>>, %arg2: memref<9x8x24xbf16, #tpu.memory_space<vmem>>, %arg3: memref<8x1xf32, #tpu.memory_space<vmem>>, %arg4: memref<1x8x128xf32, #tpu.memory_space<vmem>>) attributes {dimension_semantics = [#tpu.dimension_semantics<parallel>], iteration_bounds = array<i64: 2>, scalar_prefetch = 0 : i64, scratch_operands = 0 : i64, tpu.core_type = #tpu.core_type<tc>, window_params = [{transform_indices = @transform_0, window_bounds = array<i64: 1, 24, 150>}, {pipeline_mode = #tpu.pipeline_mode<synchronous>, transform_indices = @transform_1, window_bounds = array<i64: 9, 8, 24>}, {pipeline_mode = #tpu.pipeline_mode<synchronous>, transform_indices = @transform_2, window_bounds = array<i64: 8, 1>}, {transform_indices = @transform_3, window_bounds = array<i64: 1, 8, 128>}]} {
    %c0 = arith.constant 0 : index
    %c0_0 = arith.constant 0 : index
    %c0_1 = arith.constant 0 : index
    %0 = vector.load %arg1[%c0, %c0_0, %c0_1] : memref<1x24x150xbf16, #tpu.memory_space<vmem>>, vector<1x24x150xbf16>
    %1 = vector.shape_cast %0 : vector<1x24x150xbf16> to vector<24x150xbf16>
    %cst = arith.constant 0.000000e+00 : f32
    %2 = vector.broadcast %cst : f32 to vector<8x128xf32>
    %c0_2 = arith.constant 0 : index
    %c0_3 = arith.constant 0 : index
    %c0_4 = arith.constant 0 : index
    %3 = vector.load %arg2[%c0_2, %c0_3, %c0_4] : memref<9x8x24xbf16, #tpu.memory_space<vmem>>, vector<1x8x24xbf16>
    %4 = vector.shape_cast %3 : vector<1x8x24xbf16> to vector<8x24xbf16>
    %5 = vector.extract_strided_slice %1 {offsets = [0, 0], sizes = [24, 128], strides = [1, 1]} : vector<24x150xbf16> to vector<24x128xbf16>
    %cst_5 = arith.constant dense<0.000000e+00> : vector<8x128xf32>
    %6 = tpu.matmul %4, %5, %cst_5 {dimension_numbers = #tpu.dot_dimension_numbers<[1], [0], [0], [1], [0, 0, 1, 1], [], []>} : vector<8x24xbf16>, vector<24x128xbf16>, vector<8x128xf32> -> vector<8x128xf32>
    %7 = arith.addf %2, %6 : vector<8x128xf32>
    %c1 = arith.constant 1 : index
    %c0_6 = arith.constant 0 : index
    %c0_7 = arith.constant 0 : index
    %8 = vector.load %arg2[%c1, %c0_6, %c0_7] : memref<9x8x24xbf16, #tpu.memory_space<vmem>>, vector<1x8x24xbf16>
    %9 = vector.shape_cast %8 : vector<1x8x24xbf16> to vector<8x24xbf16>
    %10 = vector.extract_strided_slice %1 {offsets = [0, 1], sizes = [24, 128], strides = [1, 1]} : vector<24x150xbf16> to vector<24x128xbf16>
    %cst_8 = arith.constant dense<0.000000e+00> : vector<8x128xf32>
    %11 = tpu.matmul %9, %10, %cst_8 {dimension_numbers = #tpu.dot_dimension_numbers<[1], [0], [0], [1], [0, 0, 1, 1], [], []>} : vector<8x24xbf16>, vector<24x128xbf16>, vector<8x128xf32> -> vector<8x128xf32>
    %12 = arith.addf %7, %11 : vector<8x128xf32>
    %c2 = arith.constant 2 : index
    %c0_9 = arith.constant 0 : index
    %c0_10 = arith.constant 0 : index
    %13 = vector.load %arg2[%c2, %c0_9, %c0_10] : memref<9x8x24xbf16, #tpu.memory_space<vmem>>, vector<1x8x24xbf16>
    %14 = vector.shape_cast %13 : vector<1x8x24xbf16> to vector<8x24xbf16>
    %15 = vector.extract_strided_slice %1 {offsets = [0, 2], sizes = [24, 128], strides = [1, 1]} : vector<24x150xbf16> to vector<24x128xbf16>
    %cst_11 = arith.constant dense<0.000000e+00> : vector<8x128xf32>
    %16 = tpu.matmul %14, %15, %cst_11 {dimension_numbers = #tpu.dot_dimension_numbers<[1], [0], [0], [1], [0, 0, 1, 1], [], []>} : vector<8x24xbf16>, vector<24x128xbf16>, vector<8x128xf32> -> vector<8x128xf32>
    %17 = arith.addf %12, %16 : vector<8x128xf32>
    %c3 = arith.constant 3 : index
    %c0_12 = arith.constant 0 : index
    %c0_13 = arith.constant 0 : index
    %18 = vector.load %arg2[%c3, %c0_12, %c0_13] : memref<9x8x24xbf16, #tpu.memory_space<vmem>>, vector<1x8x24xbf16>
    %19 = vector.shape_cast %18 : vector<1x8x24xbf16> to vector<8x24xbf16>
    %20 = vector.extract_strided_slice %1 {offsets = [0, 10], sizes = [24, 128], strides = [1, 1]} : vector<24x150xbf16> to vector<24x128xbf16>
    %cst_14 = arith.constant dense<0.000000e+00> : vector<8x128xf32>
    %21 = tpu.matmul %19, %20, %cst_14 {dimension_numbers = #tpu.dot_dimension_numbers<[1], [0], [0], [1], [0, 0, 1, 1], [], []>} : vector<8x24xbf16>, vector<24x128xbf16>, vector<8x128xf32> -> vector<8x128xf32>
    %22 = arith.addf %17, %21 : vector<8x128xf32>
    %c4 = arith.constant 4 : index
    %c0_15 = arith.constant 0 : index
    %c0_16 = arith.constant 0 : index
    %23 = vector.load %arg2[%c4, %c0_15, %c0_16] : memref<9x8x24xbf16, #tpu.memory_space<vmem>>, vector<1x8x24xbf16>
    %24 = vector.shape_cast %23 : vector<1x8x24xbf16> to vector<8x24xbf16>
    %25 = vector.extract_strided_slice %1 {offsets = [0, 11], sizes = [24, 128], strides = [1, 1]} : vector<24x150xbf16> to vector<24x128xbf16>
    %cst_17 = arith.constant dense<0.000000e+00> : vector<8x128xf32>
    %26 = tpu.matmul %24, %25, %cst_17 {dimension_numbers = #tpu.dot_dimension_numbers<[1], [0], [0], [1], [0, 0, 1, 1], [], []>} : vector<8x24xbf16>, vector<24x128xbf16>, vector<8x128xf32> -> vector<8x128xf32>
    %27 = arith.addf %22, %26 : vector<8x128xf32>
    %c5 = arith.constant 5 : index
    %c0_18 = arith.constant 0 : index
    %c0_19 = arith.constant 0 : index
    %28 = vector.load %arg2[%c5, %c0_18, %c0_19] : memref<9x8x24xbf16, #tpu.memory_space<vmem>>, vector<1x8x24xbf16>
    %29 = vector.shape_cast %28 : vector<1x8x24xbf16> to vector<8x24xbf16>
    %30 = vector.extract_strided_slice %1 {offsets = [0, 12], sizes = [24, 128], strides = [1, 1]} : vector<24x150xbf16> to vector<24x128xbf16>
    %cst_20 = arith.constant dense<0.000000e+00> : vector<8x128xf32>
    %31 = tpu.matmul %29, %30, %cst_20 {dimension_numbers = #tpu.dot_dimension_numbers<[1], [0], [0], [1], [0, 0, 1, 1], [], []>} : vector<8x24xbf16>, vector<24x128xbf16>, vector<8x128xf32> -> vector<8x128xf32>
    %32 = arith.addf %27, %31 : vector<8x128xf32>
    %c6 = arith.constant 6 : index
    %c0_21 = arith.constant 0 : index
    %c0_22 = arith.constant 0 : index
    %33 = vector.load %arg2[%c6, %c0_21, %c0_22] : memref<9x8x24xbf16, #tpu.memory_space<vmem>>, vector<1x8x24xbf16>
    %34 = vector.shape_cast %33 : vector<1x8x24xbf16> to vector<8x24xbf16>
    %35 = vector.extract_strided_slice %1 {offsets = [0, 20], sizes = [24, 128], strides = [1, 1]} : vector<24x150xbf16> to vector<24x128xbf16>
    %cst_23 = arith.constant dense<0.000000e+00> : vector<8x128xf32>
    %36 = tpu.matmul %34, %35, %cst_23 {dimension_numbers = #tpu.dot_dimension_numbers<[1], [0], [0], [1], [0, 0, 1, 1], [], []>} : vector<8x24xbf16>, vector<24x128xbf16>, vector<8x128xf32> -> vector<8x128xf32>
    %37 = arith.addf %32, %36 : vector<8x128xf32>
    %c7 = arith.constant 7 : index
    %c0_24 = arith.constant 0 : index
    %c0_25 = arith.constant 0 : index
    %38 = vector.load %arg2[%c7, %c0_24, %c0_25] : memref<9x8x24xbf16, #tpu.memory_space<vmem>>, vector<1x8x24xbf16>
    %39 = vector.shape_cast %38 : vector<1x8x24xbf16> to vector<8x24xbf16>
    %40 = vector.extract_strided_slice %1 {offsets = [0, 21], sizes = [24, 128], strides = [1, 1]} : vector<24x150xbf16> to vector<24x128xbf16>
    %cst_26 = arith.constant dense<0.000000e+00> : vector<8x128xf32>
    %41 = tpu.matmul %39, %40, %cst_26 {dimension_numbers = #tpu.dot_dimension_numbers<[1], [0], [0], [1], [0, 0, 1, 1], [], []>} : vector<8x24xbf16>, vector<24x128xbf16>, vector<8x128xf32> -> vector<8x128xf32>
    %42 = arith.addf %37, %41 : vector<8x128xf32>
    %c8 = arith.constant 8 : index
    %c0_27 = arith.constant 0 : index
    %c0_28 = arith.constant 0 : index
    %43 = vector.load %arg2[%c8, %c0_27, %c0_28] : memref<9x8x24xbf16, #tpu.memory_space<vmem>>, vector<1x8x24xbf16>
    %44 = vector.shape_cast %43 : vector<1x8x24xbf16> to vector<8x24xbf16>
    %45 = vector.extract_strided_slice %1 {offsets = [0, 22], sizes = [24, 128], strides = [1, 1]} : vector<24x150xbf16> to vector<24x128xbf16>
    %cst_29 = arith.constant dense<0.000000e+00> : vector<8x128xf32>
    %46 = tpu.matmul %44, %45, %cst_29 {dimension_numbers = #tpu.dot_dimension_numbers<[1], [0], [0], [1], [0, 0, 1, 1], [], []>} : vector<8x24xbf16>, vector<24x128xbf16>, vector<8x128xf32> -> vector<8x128xf32>
    %47 = arith.addf %42, %46 : vector<8x128xf32>
    %c0_30 = arith.constant 0 : index
    %c0_31 = arith.constant 0 : index
    %48 = vector.load %arg3[%c0_30, %c0_31] : memref<8x1xf32, #tpu.memory_space<vmem>>, vector<8x1xf32>
    %49 = vector.broadcast %48 : vector<8x1xf32> to vector<8x128xf32>
    %50 = arith.addf %47, %49 : vector<8x128xf32>
    %c0_32 = arith.constant 0 : index
    %c0_33 = arith.constant 0 : index
    %c0_34 = arith.constant 0 : index
    %51 = vector.load %arg4[%c0_32, %c0_33, %c0_34] : memref<1x8x128xf32, #tpu.memory_space<vmem>>, vector<1x8x128xf32>
    %52 = vector.shape_cast %51 : vector<1x8x128xf32> to vector<8x128xf32>
    %53 = vector.shape_cast %50 : vector<8x128xf32> to vector<1x8x128xf32>
    tpu.vector_store %arg4[%c0_32, %c0_33, %c0_34], %53 {strides = array<i32>} : memref<1x8x128xf32, #tpu.memory_space<vmem>>, vector<1x8x128xf32>,
    return
  }
  func.func @transform_0(%arg0: i32) -> (i32, i32, i32) {
    %c0_i32 = arith.constant 0 : i32
    %c0_i32_0 = arith.constant 0 : i32
    %c0_i32_1 = arith.constant 0 : i32
    return %arg0, %c0_i32, %c0_i32_0 : i32, i32, i32
  }
  func.func @transform_1(%arg0: i32) -> (i32, i32, i32) {
    %c0_i32 = arith.constant 0 : i32
    %c0_i32_0 = arith.constant 0 : i32
    %c0_i32_1 = arith.constant 0 : i32
    %c0_i32_2 = arith.constant 0 : i32
    return %c0_i32, %c0_i32_0, %c0_i32_1 : i32, i32, i32
  }
  func.func @transform_2(%arg0: i32) -> (i32, i32) {
    %c0_i32 = arith.constant 0 : i32
    %c0_i32_0 = arith.constant 0 : i32
    %c0_i32_1 = arith.constant 0 : i32
    return %c0_i32, %c0_i32_0 : i32, i32
  }
  func.func @transform_3(%arg0: i32) -> (i32, i32, i32) {
    %c0_i32 = arith.constant 0 : i32
    %c0_i32_0 = arith.constant 0 : i32
    %c0_i32_1 = arith.constant 0 : i32
    return %arg0, %c0_i32, %c0_i32_0 : i32, i32, i32
  }
}

</mosaic_0001>

<bundles_post_ra>
// kernel: squeeze.3
= control target key start
LH: loop header
LB: loop body
LE: loop exit
PB: predicated region body
PF: predicated region fallthrough
CT: control target
= control target key end

     0   :  { %vm33_vm0 = vcmask 64512   ;;  %s384_s8 = smov 104   ;;  %s385_s9 = smov 88   ;;  %s459_s0 = inlined_call_operand.vmem [shape: bf16[1,2,8,64], index: 0, kind: input, shape index: {}]   ;;  %s460_s1 = inlined_call_operand.vmem [shape: bf16[2,8,8,8], index: 1, kind: output, shape index: {}]  }
   0x1   :  { %v291_v0 = vld [vmem:[%s459_s0] sm:$0xff]   ;;  %s383_s0 = smov 120   ;;  %s386_s10 = smov 112  }
   0x2   :  { %v292_v1 = vunpack.c.l.bf16 %v291_v0  ;;  %v293_v2 = vunpack.c.h.bf16 %v291_v0  ;;  %s387_s11 = smov 96   ;;  %s388_s12 = smov 80  }
   0x3   :  { %s389_s13 = smov 72  }
   0x4   :  { %v348_v3 = vpack.i.bf16 %v293_v2, %v292_v1  ;;  %40 = vst.msk [vmem:[#allocation0 + $0x40] ss:$8 sm:$0xf] %vm33_vm0, %v293_v2  }
   0x5   :  { %42 = vst.msk [vmem:[#allocation0 + $0x40] ss:$8 sm:$0xf0] %vm33_vm0, %v293_v2  }
   0x6   :  { %349 = vrot.lane.b32.xlu0 %v348_v3, %s383_s0  ;;  %359 = vrot.lane.b32.xlu1 %v348_v3, %s384_s8  ;;  %34 = vst.msk [vmem:[#allocation0] ss:$8 sm:$0xf] %vm33_vm0, %v292_v1  }
   0x7   :  { %35 = vst.msk [vmem:[#allocation0] ss:$8 sm:$0xf0] %vm33_vm0, %v292_v1   ;;  %369 = vrot.lane.b32.xlu2 %v348_v3, %s385_s9 }
   0xe   :  { %354 = vrot.lane.b32.xlu0 %v348_v3, %s386_s10  ;;  %364 = vrot.lane.b32.xlu1 %v348_v3, %s387_s11 }
   0xf   :  { %374 = vrot.lane.b32.xlu2 %v348_v3, %s388_s12 }
  0x16   :  { %379 = vrot.lane.b32.xlu0 %v348_v3, %s389_s13 }
  0x61   :  { %v370_v4 = vpop.permute.xlu2 %369 }
  0x62   :  { %v372_v5 = vunpack.i.h.bf16 %v370_v4  ;;  %v371_v6 = vunpack.i.l.bf16 %v370_v4 }
  0x64   :  { %125 = vst.msk [vmem:[#allocation0 + $0x45] ss:$8 sm:$0xf] %vm33_vm0, %v372_v5  }
  0x65   :  { %127 = vst.msk [vmem:[#allocation0 + $0x45] ss:$8 sm:$0xf0] %vm33_vm0, %v372_v5  }
  0x66   :  { %116 = vst.msk [vmem:[#allocation0 + $0x5] ss:$8 sm:$0xf] %vm33_vm0, %v371_v6  }
  0x67   :  { %118 = vst.msk [vmem:[#allocation0 + $0x5] ss:$8 sm:$0xf0] %vm33_vm0, %v371_v6  }
  0x69   :  { %v375_v7 = vpop.permute.xlu2 %374 }
  0x6a   :  { %v377_v8 = vunpack.i.h.bf16 %v375_v7  ;;  %v376_v9 = vunpack.i.l.bf16 %v375_v7 }
  0x6c   :  { %142 = vst.msk [vmem:[#allocation0 + $0x46] ss:$8 sm:$0xf] %vm33_vm0, %v377_v8  }
  0x6d   :  { %144 = vst.msk [vmem:[#allocation0 + $0x46] ss:$8 sm:$0xf0] %vm33_vm0, %v377_v8  }
  0x6e   :  { %133 = vst.msk [vmem:[#allocation0 + $0x6] ss:$8 sm:$0xf] %vm33_vm0, %v376_v9  }
  0x6f   :  { %135 = vst.msk [vmem:[#allocation0 + $0x6] ss:$8 sm:$0xf0] %vm33_vm0, %v376_v9  }
  0x78   :  { %v350_v10 = vpop.permute.xlu0 %349  ;;  %v360_v11 = vpop.permute.xlu1 %359 }
  0x79   :  { %v352_v12 = vunpack.i.h.bf16 %v350_v10  ;;  %v351_v13 = vunpack.i.l.bf16 %v350_v10  ;;  %v362_v14 = vunpack.i.h.bf16 %v360_v11  ;;  %v361_v15 = vunpack.i.l.bf16 %v360_v11 }
  0x7b   :  { %57 = vst.msk [vmem:[#allocation0 + $0x41] ss:$8 sm:$0xf] %vm33_vm0, %v352_v12  }
  0x7c   :  { %59 = vst.msk [vmem:[#allocation0 + $0x41] ss:$8 sm:$0xf0] %vm33_vm0, %v352_v12  }
  0x7d   :  { %48 = vst.msk [vmem:[#allocation0 + $0x1] ss:$8 sm:$0xf] %vm33_vm0, %v351_v13  }
  0x7e   :  { %50 = vst.msk [vmem:[#allocation0 + $0x1] ss:$8 sm:$0xf0] %vm33_vm0, %v351_v13  }
  0x7f   :  { %91 = vst.msk [vmem:[#allocation0 + $0x43] ss:$8 sm:$0xf] %vm33_vm0, %v362_v14  }
  0x80   :  { %93 = vst.msk [vmem:[#allocation0 + $0x43] ss:$8 sm:$0xf0] %vm33_vm0, %v362_v14   ;;  %v355_v16 = vpop.permute.xlu0 %354  ;;  %v365_v17 = vpop.permute.xlu1 %364 }
  0x81   :  { %82 = vst.msk [vmem:[#allocation0 + $0x3] ss:$8 sm:$0xf] %vm33_vm0, %v361_v15   ;;  %v357_v18 = vunpack.i.h.bf16 %v355_v16  ;;  %v356_v19 = vunpack.i.l.bf16 %v355_v16  ;;  %v367_v20 = vunpack.i.h.bf16 %v365_v17  ;;  %v366_v21 = vunpack.i.l.bf16 %v365_v17 }
  0x82   :  { %84 = vst.msk [vmem:[#allocation0 + $0x3] ss:$8 sm:$0xf0] %vm33_vm0, %v361_v15  }
  0x83   :  { %74 = vst.msk [vmem:[#allocation0 + $0x42] ss:$8 sm:$0xf] %vm33_vm0, %v357_v18  }
  0x84   :  { %76 = vst.msk [vmem:[#allocation0 + $0x42] ss:$8 sm:$0xf0] %vm33_vm0, %v357_v18  }
  0x85   :  { %65 = vst.msk [vmem:[#allocation0 + $0x2] ss:$8 sm:$0xf] %vm33_vm0, %v356_v19  }
  0x86   :  { %67 = vst.msk [vmem:[#allocation0 + $0x2] ss:$8 sm:$0xf0] %vm33_vm0, %v356_v19  }
  0x87   :  { %108 = vst.msk [vmem:[#allocation0 + $0x44] ss:$8 sm:$0xf] %vm33_vm0, %v367_v20  }
  0x88   :  { %110 = vst.msk [vmem:[#allocation0 + $0x44] ss:$8 sm:$0xf0] %vm33_vm0, %v367_v20   ;;  %v380_v22 = vpop.permute.xlu0 %379 }
  0x89   :  { %99 = vst.msk [vmem:[#allocation0 + $0x4] ss:$8 sm:$0xf] %vm33_vm0, %v366_v21   ;;  %v382_v23 = vunpack.i.h.bf16 %v380_v22  ;;  %v381_v24 = vunpack.i.l.bf16 %v380_v22 }
  0x8a   :  { %101 = vst.msk [vmem:[#allocation0 + $0x4] ss:$8 sm:$0xf0] %vm33_vm0, %v366_v21  }
  0x8b   :  { %159 = vst.msk [vmem:[#allocation0 + $0x47] ss:$8 sm:$0xf] %vm33_vm0, %v382_v23  }
  0x8c   :  { %161 = vst.msk [vmem:[#allocation0 + $0x47] ss:$8 sm:$0xf0] %vm33_vm0, %v382_v23  }
  0x8d   :  { %150 = vst.msk [vmem:[#allocation0 + $0x7] ss:$8 sm:$0xf] %vm33_vm0, %v381_v24  }
  0x8e   :  { %152 = vst.msk [vmem:[#allocation0 + $0x7] ss:$8 sm:$0xf0] %vm33_vm0, %v381_v24  }
  0x92   :  { %v219_v25 = vld [vmem:[#allocation0 + $0x40] sm:$0xff]  ;;  %v226_v26 = vld [vmem:[#allocation0 + $0x48] sm:$0xff]  ;;  %v233_v27 = vld [vmem:[#allocation0 + $0x50] sm:$0xff] }
  0x93   :  { %v317_v28 = vpack.c.bf16 %v226_v26, %v219_v25  ;;  %v240_v29 = vld [vmem:[#allocation0 + $0x58] sm:$0xff]  ;;  %v247_v30 = vld [vmem:[#allocation0 + $0x60] sm:$0xff]  ;;  %v254_v31 = vld [vmem:[#allocation0 + $0x68] sm:$0xff] }
  0x94   :  { %v322_v32 = vpack.c.bf16 %v240_v29, %v233_v27  ;;  %v164_v33 = vld [vmem:[#allocation0] sm:$0xff]  ;;  %v170_v34 = vld [vmem:[#allocation0 + $0x8] sm:$0xff]  ;;  %v177_v35 = vld [vmem:[#allocation0 + $0x10] sm:$0xff]  ;;  %v327_v46 = vpack.c.bf16 %v254_v31, %v247_v30 }
  0x95   :  { %337 = vst [vmem:[%s460_s1 + $0x20] sm:$0xff] %v317_v28   ;;  %v297_v36 = vpack.c.bf16 %v170_v34, %v164_v33  ;;  %v184_v37 = vld [vmem:[#allocation0 + $0x18] sm:$0xff]  ;;  %v191_v38 = vld [vmem:[#allocation0 + $0x20] sm:$0xff]  ;;  %v198_v39 = vld [vmem:[#allocation0 + $0x28] sm:$0xff] }
  0x96   :  { %338 = vst [vmem:[%s460_s1 + $0x28] sm:$0xff] %v322_v32   ;;  %v302_v40 = vpack.c.bf16 %v184_v37, %v177_v35  ;;  %v307_v41 = vpack.c.bf16 %v198_v39, %v191_v38  ;;  %v205_v42 = vld [vmem:[#allocation0 + $0x30] sm:$0xff]  ;;  %v212_v43 = vld [vmem:[#allocation0 + $0x38] sm:$0xff] }
  0x97   :  { %v261_v44 = vld [vmem:[#allocation0 + $0x70] sm:$0xff]  ;;  %298 = vst [vmem:[%s460_s1] sm:$0xff] %v297_v36   ;;  %v312_v45 = vpack.c.bf16 %v212_v43, %v205_v42  ;;  %v268_v47 = vld [vmem:[#allocation0 + $0x78] sm:$0xff] }
  0x98   :  { %334 = vst [vmem:[%s460_s1 + $0x8] sm:$0xff] %v302_v40   ;;  %v332_v48 = vpack.c.bf16 %v268_v47, %v261_v44 }
  0x99   :  { %335 = vst [vmem:[%s460_s1 + $0x10] sm:$0xff] %v307_v41  }
  0x9a   :  { %336 = vst [vmem:[%s460_s1 + $0x18] sm:$0xff] %v312_v45  }
  0x9b   :  { %339 = vst [vmem:[%s460_s1 + $0x30] sm:$0xff] %v327_v46  }
  0x9c   :  { %340 = vst [vmem:[%s460_s1 + $0x38] sm:$0xff] %v332_v48  }

// kernel: gkan_forward.2
= control target key start
LH: loop header
LB: loop body
LE: loop exit
PB: predicated region body
PF: predicated region fallthrough
CT: control target
= control target key end

     0   :  { %10 = vsyncpa [#allocation3], 0  ;;  %s927_s18 = smov 0   ;;  %s929_s19 = smov 0   ;;  %s1055_s0 = inlined_call_operand.vmem [shape: f32[3,2,8,64], index: 0, kind: input, shape index: {}]   ;;  %s1056_s1 = inlined_call_operand.vmem [shape: bf16[3,4,8,8], index: 1, kind: input, shape index: {}]   ;;  %s1057_s2 = inlined_call_operand.vmem [shape: f32[3,8,1], index: 2, kind: input, shape index: {}]   ;;  %s1058_s3 = inlined_call_operand.vmem [shape: bf16[3,8,8], index: 3, kind: input, shape index: {}]   ;;  %s1059_s4 = inlined_call_operand.vmem [shape: f32[3,4], index: 4, kind: input, shape index: {}]   ;;  %s1060_s5 = inlined_call_operand.vmem [shape: bf16[3,2,8,64], index: 5, kind: output, shape index: {}]  }
   0x1   :  { %s931_s20 = smov 0   ;;  %s933_s21 = smov 0  }
   0x2   :  { %s935_s22 = smov 0  }
   0x3 LB: > { %s727_s23 = sadd.s32 4294967295, %s893_s22   ;;  %s25_s24 = sadd.s32 1, %s885_s20  ;;  %s893_s22 = sphi %s935_s22, %s16_s22   ;;  %s889_s21 = sphi %s933_s21, %s1066_s21   ;;  %s885_s20 = sphi %s931_s20, %s1065_s20   ;;  %s881_s19 = sphi %s929_s19, %s1064_s19   ;;  %s877_s18 = sphi %s927_s18, %s1063_s18  }
   0x4   : > { %p26_p0 = scmp.ge.s32.totalorder %s25_s24, 2  ;;  %s28_s25 = sadd.s32 1, %s889_s21 }
   0x5   : > { %p729_p1 = scmp.ge.s32.totalorder %s893_s22, 1  ;;  %p188_p2 = scmp.lt.s32.totalorder %s893_s22, 7 }
   0x6   : > { %s1068_s24 = smov (%p26_p0, %s25_s24), 0  ;;  %s1070_s25 = smov (!%p26_p0, %s28_s25), %s889_s21 }
   0x7   : > { %p189_p3 = pnand %p729_p1, %p188_p2  ;;  %p30_p4 = scmp.ge.s32.totalorder %s1070_s25, 3 }
   0x8   : > { %p767_p5 = scmp.eq.s32.totalorder %s727_s23, 0  ;;  %s200_s28 = sshll.u32 %s1059_s4, 4  ;;  %s201_s28 = int_to_ptr.vmem [resolvable:$true] %s200_s28 }
   0x9   : > { %p763_p6 = pneg %p189_p3  ;;  %s1072_s25 = smov (%p30_p4, %s1070_s25), 0 }
   0xa   : > { %s895_s29 = smov [#allocation2]   ;;  %246 = sbr.rel (%p189_p3) target bundleno = 533 (0x215), region = 40 }
   0xb   : > { %p764_p7 = pnand %p767_p5, %p763_p6 }
   0xd   : > { %766 = dma.vmem_to_smem (!%p764_p7), %s201_s28, 64, %s895_s29, [#allocation3]  }
   0xf   : > { %872 = dma.done.wait (%p767_p5), [#allocation3], 64  }
  0x10   : > { %874 = vsyncadd (%p767_p5), [#allocation3], 4294967232 }
  0x11   : > { %253 = sfence }
  0x12   : > { %p295_p8 = scmp.lt.s32.totalorder %s881_s19, 2  ;;  %p297_p9 = scmp.lt.s32.totalorder %s877_s18, 1  ;;  %v896_v26 = vmov 0   ;;  %vm353_vm6 = vcmask 1043456   ;;  %vm349_vm11 = vcmask 64512  }
  0x13   : > { %s747_s8 = sshll.u32 %s881_s19, 7  ;;  %811 = vset.pattern.permute.xlu0 %v896_v26 }
  0x14   : > { %s968_s30 = scalar_select %p295_p8, %s881_s19, 2 }
  0x15   : > { %s1074_s18 = smov (!%p297_p9, %s877_s18), 1  ;;  %s422_s13 = sadd.s32 2, %s747_s8 }
  0x16   : > { %s734_s6 = sshll.u32 %s968_s30, 1  ;;  %s470_s14 = sadd.s32 3, %s747_s8 }
  0x17   : > { %s972_s7 = sadd.s32 %s734_s6, %s1074_s18  ;;  %s423_s15 = sld [smem:[#allocation2 + %s422_s13]] }
  0x18   : > { %s735_s9 = sshll.u32 %s972_s7, 3  ;;  %s471_s16 = sld [smem:[#allocation2 + %s470_s14]] }
  0x19   : > { %s302_s12 = scalar_lea.vmem %s1055_s0, %s735_s9  ;;  %s738_s17 = sshll.u32 %s968_s30, 3 }
  0x1a   : > { %v979_v0 = vld [vmem:[%s302_s12] sm:$0xff]  ;;  %s311_s23 = scalar_lea.vmem %s1057_s2, %s738_s17  ;;  %s758_s26 = sshll.u32 %s968_s30, 4 }
  0x1b   : > { %v742_v1 = vmul.f32 -1.442695, %v979_v0  ;;  %812 = vtanh.f32 %v979_v0  ;;  %v326_v24 = vld [vmem:[%s311_s23] sm:$0xff]  ;;  %s1010_s29 = scalar_lea.vmem %s1056_s1, %s758_s26  ;;  %s739_s6 = sshll.u32 %s968_s30, 2 }
  0x1c   : > { %372 = vperm.xlu0 %811, %v326_v24   ;;  %v327_v51 = vld [vmem:[%s1010_s29] sm:$0xf]  ;;  %s315_s10 = scalar_lea.vmem %s1058_s3, %s739_s6  ;;  %s741_s11 = sshll.u32 %s972_s7, 2 }
  0x1d   : > { %814 = vpow2.f32 %v742_v1  ;;  %v424_v3 = vstv %s423_s15  ;;  %s323_s30 = scalar_lea.vmem %s1060_s5, %s741_s11 }
  0x1e   : > { %v472_v6 = vstv %s471_s16 }
  0x21   : > { %v983_v2 = vpop.eup %812 }
  0x22   : > { %v745_v4 = vmul.f32 -1.442695, %v983_v2  ;;  %v420_v5 = vmul.f32 %v983_v2, %v983_v2  ;;  %v473_v10 = vmul.f32 %v983_v2, %v472_v6 }
  0x23   : > { %v815_v7 = vpop.eup %814 }
  0x24   : > { %v331_v8 = vadd.f32 1.0, %v815_v7  ;;  %816 = vpow2.f32 %v745_v4  ;;  %v988_v9 = vsub.f32 %v420_v5, %v424_v3  ;;  %v744_v5 = vld [vmem:[%s1010_s29 + $0x4] sm:$0xf] }
  0x26   : > { %818 = vrcp.f32 %v331_v8  ;;  %v749_v11 = vmul.f32 -1.442695, %v988_v9  ;;  %v469_v12 = vmul.f32 %v983_v2, %v988_v9  ;;  %v343_v19 = vand.u32 2147483648, %v331_v8 }
  0x27   : > { %vm337_vm0 = vweird.f32 %v331_v8  ;;  %v341_v22 = vand.u32 2147483647, %v331_v8 }
  0x28   : > { %820 = vpow2.f32 %v749_v11  ;;  %v994_v13 = vsub.f32 %v469_v12, %v473_v10  ;;  %v344_v27 = vor.u32 1.1754944e-38, %v343_v19 }
  0x29   : > { %vm342_vm3 = vcmp.eq.f32.partialorder %v341_v22, 8.507059e+37 }
  0x2a   : > { %v817_v14 = vpop.eup %816  ;;  %v752_v16 = vmul.f32 -1.442695, %v994_v13 }
  0x2b   : > { %v382_v15 = vadd.f32 1.0, %v817_v14  ;;  %v748_v14 = vld [vmem:[%s1010_s29 + $0x8] sm:$0xf] }
  0x2c   : > { %v819_v17 = vpop.eup %818 }
  0x2d   : > { %v333_v18 = vmul.f32 %v819_v17, %v331_v8  ;;  %822 = vrcp.f32 %v382_v15  ;;  %vm338_vm1 = vweird.f32 %v819_v17  ;;  %vm388_vm4 = vweird.f32 %v382_v15 }
  0x2e   : > { %824 = vpow2.f32 %v752_v16  ;;  %v821_v20 = vpop.eup %820  ;;  %vm339_vm2 = vmor %vm337_vm0, %vm338_vm1  ;;  %v394_v33 = vand.u32 2147483648, %v382_v15  ;;  %v392_v37 = vand.u32 2147483647, %v382_v15 }
  0x2f   : > { %v334_v21 = vsub.f32 1.0, %v333_v18  ;;  %v431_v23 = vadd.f32 1.0, %v821_v20 }
  0x30   : > { %v395_v43 = vor.u32 1.1754944e-38, %v394_v33  ;;  %vm393_vm8 = vcmp.eq.f32.partialorder %v392_v37, 8.507059e+37 }
  0x31   : > { %v335_v25 = vmul.f32 %v819_v17, %v334_v21  ;;  %826 = vrcp.f32 %v431_v23  ;;  %vm437_vm9 = vweird.f32 %v431_v23  ;;  %v443_v46 = vand.u32 2147483648, %v431_v23 }
  0x32   : > { %v441_v49 = vand.u32 2147483647, %v431_v23 }
  0x33   : > { %v823_v28 = vpop.eup %822  ;;  %v336_v29 = vadd.f32 %v819_v17, %v335_v25  ;;  %v444_v56 = vor.u32 1.1754944e-38, %v443_v46 }
  0x34   : > { %v825_v30 = vpop.eup %824  ;;  %v384_v31 = vmul.f32 %v823_v28, %v382_v15  ;;  %vm389_vm5 = vweird.f32 %v823_v28  ;;  %vm442_vm13 = vcmp.eq.f32.partialorder %v441_v49, 8.507059e+37 }
  0x35   : > { %v340_v32 = vsel %vm339_vm2, %v819_v17, %v336_v29  ;;  %v480_v34 = vadd.f32 1.0, %v825_v30  ;;  %vm1003_vm7 = vmor %vm388_vm4, %vm389_vm5  ;;  %v751_v17 = vld [vmem:[%s1010_s29 + $0xc] sm:$0xf]  ;;  %vm518_vm2 = vcmask 523264  }
  0x36   : > { %v345_v35 = vsel %vm342_vm3, %v344_v27, %v340_v32  ;;  %v385_v36 = vsub.f32 1.0, %v384_v31 }
  0x37   : > { %v347_v38 = vmul.f32 %v345_v35, %v979_v0  ;;  %828 = vrcp.f32 %v480_v34  ;;  %v827_v39 = vpop.eup %826  ;;  %vm486_vm14 = vweird.f32 %v480_v34  ;;  %v492_v59 = vand.u32 2147483648, %v480_v34 }
  0x38   : > { %v386_v40 = vmul.f32 %v823_v28, %v385_v36  ;;  %v433_v44 = vmul.f32 %v827_v39, %v431_v23  ;;  %vm438_vm10 = vweird.f32 %v827_v39  ;;  %v490_v62 = vand.u32 2147483647, %v480_v34 }
  0x39   : > { %v348_v41 = vpack.c.bf16 %v347_v38, %v347_v38  ;;  %vm439_vm12 = vmor %vm437_vm9, %vm438_vm10  ;;  %v493_v6 = vor.u32 1.1754944e-38, %v492_v59 }
  0x3a   : > { %v387_v45 = vadd.f32 %v823_v28, %v386_v40  ;;  %v434_v48 = vsub.f32 1.0, %v433_v44  ;;  %vm491_vm1 = vcmp.eq.f32.partialorder %v490_v62, 8.507059e+37 }
  0x3b   : > { %v355_v47 = vsel %vm353_vm6, %v348_v41, 0 }
  0x3c   : > { %364 = vmatpush.bf16.msra.mxu0 %v355_v47  ;;  %v391_v50 = vsel %vm1003_vm7, %v823_v28, %v387_v45  ;;  %v435_v54 = vmul.f32 %v827_v39, %v434_v48 }
  0x3d   : > { %v829_v52 = vpop.eup %828  ;;  %v396_v53 = vsel %vm393_vm8, %v395_v43, %v391_v50 }
  0x3e   : > { %v398_v55 = vmul.f32 %v983_v2, %v396_v53  ;;  %v482_v57 = vmul.f32 %v829_v52, %v480_v34  ;;  %v436_v58 = vadd.f32 %v827_v39, %v435_v54  ;;  %vm487_vm15 = vweird.f32 %v829_v52 }
  0x3f   : > { %743 = vmatmul.msk.bf16.vlgmr.msra.gmra.mxu0 %vm349_vm11, %v327_v51  ;;  %vm488_vm0 = vmor %vm486_vm14, %vm487_vm15 }
  0x40   : > { %v399_v60 = vpack.c.bf16 %v398_v55, %v398_v55  ;;  %v483_v61 = vsub.f32 1.0, %v482_v57  ;;  %v440_v63 = vsel %vm439_vm12, %v827_v39, %v436_v58 }
  0x41   : > { %v445_v3 = vsel %vm442_vm13, %v444_v56, %v440_v63  ;;  %vm590_vm13 = vcmask 519168  }
  0x42   : > { %v404_v1 = vsel %vm353_vm6, %v399_v60, 0  ;;  %v484_v2 = vmul.f32 %v829_v52, %v483_v61  ;;  %v447_v4 = vmul.f32 %v445_v3, %v988_v9 }
  0x43   : > { %413 = vmatpush.bf16.msra.mxu1 %v404_v1 }
  0x44   : > { %v485_v7 = vadd.f32 %v829_v52, %v484_v2  ;;  %v448_v8 = vpack.c.bf16 %v447_v4, %v447_v4  ;;  %v564_v4 = vld [vmem:[%s315_s10] sm:$0xf] }
  0x46   : > { %746 = vmatmul.msk.bf16.vlgmr.msra.gmra.mxu1 %vm349_vm11, %v744_v5  ;;  %v489_v10 = vsel %vm488_vm0, %v829_v52, %v485_v7  ;;  %v453_v11 = vsel %vm353_vm6, %v448_v8, 0 }
  0x47   : > { %v494_v12 = vsel %vm491_vm1, %v493_v6, %v489_v10  ;;  %462 = vmatpush.bf16.msra.mxu2 %v453_v11 }
  0x48   : > { %v496_v15 = vmul.f32 %v494_v12, %v994_v13 }
  0x4a   : > { %v497_v16 = vpack.c.bf16 %v496_v15, %v496_v15  ;;  %750 = vmatmul.msk.bf16.vlgmr.msra.gmra.mxu2 %vm349_vm11, %v748_v14 }
  0x4c   : > { %v502_v9 = vsel %vm353_vm6, %v497_v16, 0 }
  0x4d   : > { %511 = vmatpush.bf16.msra.mxu3 %v502_v9 }
  0x50   : > { %753 = vmatmul.msk.bf16.vlgmr.msra.gmra.mxu3 %vm349_vm11, %v751_v17 }
  0x8e   : > { %v373_v21 = vpop.permute.xlu0 %372 }
  0xbc   : > { %v366_v18 = vpop.f32.mrf.mxu0 }
  0xbd   : > { %v375_v22 = vadd.f32 %v373_v21, %v366_v18 }
  0xc3   : > { %v415_v19 = vpop.f32.mrf.mxu1 }
  0xc4   : > { %v368_v20 = vpop.f32.mrf.mxu0  ;;  %v419_v24 = vadd.f32 %v415_v19, %v375_v22 }
  0xcb   : > { %v417_v23 = vpop.f32.mrf.mxu1 }
  0xcd   : > { %v464_v25 = vpop.f32.mrf.mxu2 }
  0xce   : > { %v468_v26 = vadd.f32 %v464_v25, %v419_v24 }
  0xd3   : > { %v513_v27 = vpop.f32.mrf.mxu3 }
  0xd4   : > { %v517_v13 = vadd.f32 %v513_v27, %v468_v26 }
  0xd5   : > { %v466_v28 = vpop.f32.mrf.mxu2 }
  0xd6   : > { %v519_v29 = vsel %vm518_vm2, %v517_v13, 0.0  ;;  %v523_v30 = vmul.f32 %v517_v13, %v517_v13 }
  0xd7   : > { %520 = vadd.xlane.f32.xlu0 %v519_v29 }
  0xd8   : > { %v524_v31 = vsel %vm518_vm2, %v523_v30, 0.0 }
  0xd9   : > { %525 = vadd.xlane.f32.xlu1 %v524_v31 }
  0xdb   : > { %v515_v32 = vpop.f32.mrf.mxu3 }
 0x14a   : > { %v521_v33 = vpop.xlane.xlu0 %520 }
 0x14b   : > { %v522_v34 = vmul.f32 0.015625, %v521_v33 }
 0x14c   : > { %v526_v35 = vpop.xlane.xlu1 %525 }
 0x14d   : > { %v528_v36 = vmul.f32 %v522_v34, %v522_v34  ;;  %v527_v37 = vmul.f32 0.015625, %v526_v35  ;;  %v542_v47 = vsub.f32 %v517_v13, %v522_v34 }
 0x14f   : > { %v529_v38 = vsub.f32 %v527_v37, %v528_v36 }
 0x151   : > { %v530_v39 = vmax.f32 %v529_v38, 0.0 }
 0x153   : > { %v531_v40 = vadd.f32 1e-05, %v530_v39 }
 0x155   : > { %830 = vrsqrt.f32 %v531_v40  ;;  %vm538_vm4 = vweird.f32 %v531_v40 }
 0x15b   : > { %v831_v41 = vpop.eup %830 }
 0x15c   : > { %v533_v42 = vmul.f32 %v831_v41, %v531_v40  ;;  %vm539_vm3 = vweird.f32 %v831_v41 }
 0x15d   : > { %vm540_vm5 = vmor %vm538_vm4, %vm539_vm3 }
 0x15e   : > { %v534_v43 = vmul.f32 %v831_v41, %v533_v42 }
 0x160   : > { %v535_v44 = vmul.f32 0.5, %v534_v43 }
 0x162   : > { %v536_v45 = vsub.f32 1.5, %v535_v44 }
 0x164   : > { %v537_v46 = vmul.f32 %v831_v41, %v536_v45 }
 0x166   : > { %v541_v48 = vsel %vm540_vm5, %v831_v41, %v537_v46 }
 0x167   : > { %v543_v49 = vmul.f32 %v542_v47, %v541_v48 }
 0x169   : > { %v754_v50 = vmul.f32 -1.442695, %v543_v49 }
 0x16b   : > { %832 = vpow2.f32 %v754_v50 }
 0x171   : > { %v833_v51 = vpop.eup %832 }
 0x172   : > { %v547_v52 = vadd.f32 1.0, %v833_v51 }
 0x174   : > { %834 = vrcp.f32 %v547_v52  ;;  %v559_v56 = vand.u32 2147483648, %v547_v52  ;;  %v557_v58 = vand.u32 2147483647, %v547_v52  ;;  %vm553_vm8 = vweird.f32 %v547_v52 }
 0x176   : > { %v560_v60 = vor.u32 1.1754944e-38, %v559_v56  ;;  %vm558_vm10 = vcmp.eq.f32.partialorder %v557_v58, 8.507059e+37 }
 0x17a   : > { %v835_v53 = vpop.eup %834 }
 0x17b   : > { %v549_v54 = vmul.f32 %v835_v53, %v547_v52  ;;  %vm554_vm7 = vweird.f32 %v835_v53 }
 0x17c   : > { %vm555_vm9 = vmor %vm553_vm8, %vm554_vm7 }
 0x17d   : > { %v550_v55 = vsub.f32 1.0, %v549_v54 }
 0x17f   : > { %v551_v57 = vmul.f32 %v835_v53, %v550_v55 }
 0x181   : > { %v552_v59 = vadd.f32 %v835_v53, %v551_v57 }
 0x183   : > { %v556_v61 = vsel %vm555_vm9, %v835_v53, %v552_v59 }
 0x184   : > { %v561_v62 = vsel %vm558_vm10, %v560_v60, %v556_v61 }
 0x185   : > { %v563_v63 = vmul.f32 %v561_v62, %v543_v49 }
 0x187   : > { %v565_v1 = vadd.f32 %v563_v63, %v979_v0 }
 0x189   : > { %v566_v3 = vpack.c.bf16 %v565_v1, %v565_v1 }
 0x18b   : > { %v571_v2 = vsel %vm353_vm6, %v566_v3, 0 }
 0x18c   : > { %580 = vmatpush.bf16.msrb.mxu0 %v571_v2 }
 0x18f   : > { %755 = vmatmul.msk.bf16.vlgmr.msrb.gmra.mxu0 %vm349_vm11, %v564_v4 }
 0x20c   : > { %v582_v5 = vpop.f32.mrf.mxu0 }
 0x20d   : > { %vm586_vm12 = vcmp.gt.f32.partialorder %v582_v5, 0.0  ;;  %v587_v6 = vmul.f32 0.2, %v582_v5 }
 0x20f   : > { %v588_v0 = vsel %vm586_vm12, %v582_v5, %v587_v6 }
 0x210   : > { %v589_v7 = vpack.c.bf16 %v588_v0, %v588_v0 }
 0x212   : > { %591 = vst.msk [vmem:[%s323_s30] sm:$0xf] %vm590_vm13, %v589_v7 }
 0x214   : > { %v584_v8 = vpop.f32.mrf.mxu0 }
 0x215 PF: > { %s16_s22 = sadd.s32 1, %s893_s22   ;;  %s1063_s18 = smov %s885_s20 }
 0x216   : > { %p13_p10 = scmp.ge.s32.totalorder %s16_s22, 8   ;;  %s1064_s19 = smov %s889_s21 }
 0x217   : > { %s1065_s20 = smov %s1068_s24  ;;  %s1066_s21 = smov %s1072_s25 }
 0x218   :  { %15 = sbr.rel (!%p13_p10) target bundleno = 3 (0x3), region = 87 }
 0x21d   :  { %619 = vsyncpa [#allocation3], 1 }
 0x21e   :  { %621 = vsyncpa [#allocation3 + $0x1], 1 }

// kernel: gkan_forward.3
= control target key start
LH: loop header
LB: loop body
LE: loop exit
PB: predicated region body
PF: predicated region fallthrough
CT: control target
= control target key end

     0   :  { %s634_s12 = smov 0   ;;  %s722_s0 = inlined_call_operand.vmem [shape: bf16[2,24,150], index: 0, kind: input, shape index: {}]   ;;  %s723_s1 = inlined_call_operand.vmem [shape: bf16[9,8,24], index: 1, kind: input, shape index: {}]   ;;  %s724_s2 = inlined_call_operand.vmem [shape: f32[8,1], index: 2, kind: input, shape index: {}]   ;;  %s725_s3 = inlined_call_operand.vmem [shape: f32[2,8,128], index: 3, kind: output, shape index: {}]  }
   0x1 LB: > { %s541_s13 = sadd.s32 4294967295, %s603_s12   ;;  %p545_p0 = scmp.ge.s32.totalorder %s603_s12, 1  ;;  %s603_s12 = sphi %s634_s12, %s13_s12  }
   0x2   : > { %p137_p1 = scmp.lt.s32.totalorder %s603_s12, 3 }
   0x4   : > { %p138_p2 = pnand %p545_p0, %p137_p1 }
   0x5   : > { %p160_p3 = scmp.lt.s32.totalorder (!%p138_p2), %s541_s13, 1  ;;  %s605_s18 = smov (!%p138_p2), 127  }
   0x6   : > { %141 = sbr.rel (%p138_p2) target bundleno = 353 (0x161), region = 32  ;;  %s606_s19 = smov (!%p138_p2), 126  }
   0x7   : > { %s607_s20 = smov (!%p138_p2), 118   ;;  %s608_s21 = smov (!%p138_p2), 117  }
   0x8   : > { %s609_s22 = smov (!%p138_p2), 108   ;;  %s610_s23 = smov (!%p138_p2), 107  }
   0x9   : > { %s611_s24 = smov (!%p138_p2), 116   ;;  %s612_s25 = smov (!%p138_p2), 106  }
   0xb   : > { %s727_s13 = smov (!%p160_p3, %s541_s13), 1  ;;  %vm252_vm0 = vcmask 1031168   ;;  %vm205_vm1 = vcmask 1043456   ;;  %vm197_vm2 = vcmask 1039360   ;;  %vm286_vm3 = vcmask 965632   ;;  %v480_v55 = vld [vmem:[%s724_s2] sm:$0xff] }
   0xc   : > { %s577_s14 = smul.u32 24, %s727_s13  ;;  %v548_v26 = vld [vmem:[%s723_s1 + $0x4] sm:$0xf]  ;;  %vm201_vm4 = vcmask 195584   ;;  %v173_v31 = vld [vmem:[%s723_s1] sm:$0xf] }
   0xd   : > { %v561_v35 = vld [vmem:[%s723_s1 + $0xc] sm:$0xf]  ;;  %v559_v37 = vld [vmem:[%s723_s1 + $0x8] sm:$0xf]  ;;  %vm320_vm5 = vcmask 957440   ;;  %vm388_vm6 = vcmask 883712  }
   0xe   : > { %s164_s17 = scalar_lea.vmem %s722_s0, %s577_s14  ;;  %v563_v49 = vld [vmem:[%s723_s1 + $0x10] sm:$0xf]  ;;  %vm422_vm7 = vcmask 875520   ;;  %vm354_vm8 = vcmask 949248   ;;  %v613_v57 = vmov 0   ;;  %vm456_vm9 = vcmask 867328  }
   0xf   : > { %v551_v0 = vld [vmem:[%s164_s17] sm:$0xf]  ;;  %v576_v1 = vld [vmem:[%s164_s17 + $0x4] sm:$0xf0]  ;;  %v172_v2 = vld [vmem:[%s164_s17 + $0x10] sm:$0xff]  ;;  %595 = vset.pattern.permute.xlu2 %v613_v57  ;;  %596 = vset.pattern.permute.xlu0 %v613_v57 }
  0x10   : > { %v648_v3 = vor.u32 %v576_v1, %v551_v0  ;;  %v183_v4 = vunpack.c.l.b16 %v172_v2  ;;  %v575_v6 = vld [vmem:[%s164_s17 + $0x4] sm:$0xf]  ;;  %v553_v7 = vld [vmem:[%s164_s17 + $0x8] sm:$0xf0]  ;;  %v184_v8 = vunpack.c.h.b16 %v172_v2  ;;  %v567_v60 = vld [vmem:[%s723_s1 + $0x18] sm:$0xf] }
  0x11   : > { %v556_v9 = vor.u32 %v575_v6, %v553_v7 }
  0x12   : > { %189 = vrot.lane.b32.xlu1 %v648_v3, %s605_s18  ;;  %v187_v5 = vpack.c.b16 %v183_v4, %v183_v4  ;;  %v188_v10 = vpack.c.b16 %v184_v8, %v184_v8  ;;  %v565_v8 = vld [vmem:[%s723_s1 + $0x14] sm:$0xf] }
  0x14   : > { %193 = vrot.lane.b32.xlu0 %v187_v5, %s605_s18  ;;  %248 = vrot.lane.b32.xlu2 %v187_v5, %s606_s19  ;;  %v227_v23 = vsel %vm205_vm1, %v187_v5, 0 }
  0x15   : > { %235 = vmatpush.bf16.msra.mxu1 %v227_v23 }
  0x19   : > { %236 = vmatpush.bf16.msra.mxu1 %v648_v3 }
  0x1a   : > { %191 = vrot.lane.b32.xlu1 %v556_v9, %s605_s18 }
  0x1c   : > { %195 = vrot.lane.b32.xlu0 %v188_v10, %s605_s18  ;;  %250 = vrot.lane.b32.xlu2 %v188_v10, %s606_s19 }
  0x1d   : > { %558 = vmatmul.msk.bf16.vlgmr.msra.gmra.mxu1 %vm201_vm4, %v173_v31 }
  0x22   : > { %284 = vrot.lane.b32.xlu1 %v188_v10, %s607_s20 }
  0x24   : > { %282 = vrot.lane.b32.xlu0 %v187_v5, %s607_s20  ;;  %244 = vrot.lane.b32.xlu2 %v648_v3, %s606_s19 }
  0x2a   : > { %278 = vrot.lane.b32.xlu1 %v648_v3, %s607_s20 }
  0x2c   : > { %246 = vrot.lane.b32.xlu0 %v556_v9, %s606_s19  ;;  %280 = vrot.lane.b32.xlu2 %v556_v9, %s607_s20 }
  0x32   : > { %318 = vrot.lane.b32.xlu1 %v188_v10, %s608_s21 }
  0x34   : > { %316 = vrot.lane.b32.xlu0 %v187_v5, %s608_s21  ;;  %312 = vrot.lane.b32.xlu2 %v648_v3, %s608_s21 }
  0x3a   : > { %384 = vrot.lane.b32.xlu1 %v187_v5, %s609_s22 }
  0x3c   : > { %314 = vrot.lane.b32.xlu0 %v556_v9, %s608_s21  ;;  %386 = vrot.lane.b32.xlu2 %v188_v10, %s609_s22  ;;  %s547_s21 = sshll.u32 %s727_s13, 3 }
  0x42   : > { %420 = vrot.lane.b32.xlu1 %v188_v10, %s610_s23 }
  0x44   : > { %418 = vrot.lane.b32.xlu0 %v187_v5, %s610_s23  ;;  %350 = vrot.lane.b32.xlu2 %v187_v5, %s611_s24 }
  0x4a   : > { %380 = vrot.lane.b32.xlu1 %v648_v3, %s609_s22 }
  0x4c   : > { %352 = vrot.lane.b32.xlu0 %v188_v10, %s611_s24  ;;  %382 = vrot.lane.b32.xlu2 %v556_v9, %s609_s22 }
  0x52   : > { %416 = vrot.lane.b32.xlu1 %v556_v9, %s610_s23 }
  0x54   : > { %414 = vrot.lane.b32.xlu0 %v648_v3, %s610_s23  ;;  %452 = vrot.lane.b32.xlu2 %v187_v5, %s612_s25 }
  0x5a   : > { %346 = vrot.lane.b32.xlu1 %v648_v3, %s611_s24 }
  0x5c   : > { %454 = vrot.lane.b32.xlu0 %v188_v10, %s612_s25  ;;  %348 = vrot.lane.b32.xlu2 %v556_v9, %s611_s24  ;;  %s168_s24 = scalar_lea.vmem %s725_s3, %s547_s21 }
  0x62   : > { %450 = vrot.lane.b32.xlu1 %v556_v9, %s612_s25 }
  0x64   : > { %448 = vrot.lane.b32.xlu0 %v648_v3, %s612_s25  ;;  %483 = vperm.xlu2 %595, %v480_v55   ;;  %v569_v3 = vld [vmem:[%s723_s1 + $0x1c] sm:$0xf] }
  0x6e   : > { %v249_v11 = vpop.permute.xlu2 %248 }
  0x76   : > { %v251_v12 = vpop.permute.xlu2 %250 }
  0x77   : > { %v254_v13 = vsel %vm252_vm0, %v249_v11, %v251_v12 }
  0x78   : > { %v260_v14 = vsel %vm205_vm1, %v254_v13, 0 }
  0x79   : > { %268 = vmatpush.bf16.msra.mxu2 %v260_v14  ;;  %v571_v14 = vld [vmem:[%s723_s1 + $0x20] sm:$0xf] }
  0x7e   : > { %v245_v16 = vpop.permute.xlu2 %244 }
  0x84   : > { %v190_v15 = vpop.permute.xlu1 %189 }
  0x86   : > { %v194_v17 = vpop.permute.xlu0 %193  ;;  %v281_v20 = vpop.permute.xlu2 %280 }
  0x8c   : > { %v192_v18 = vpop.permute.xlu1 %191 }
  0x8d   : > { %v198_v25 = vsel %vm197_vm2, %v190_v15, %v192_v18 }
  0x8e   : > { %v196_v19 = vpop.permute.xlu0 %195  ;;  %v313_v30 = vpop.permute.xlu2 %312 }
  0x8f   : > { %v199_v21 = vsel %vm197_vm2, %v194_v17, %v196_v19 }
  0x90   : > { %v207_v22 = vsel %vm205_vm1, %v199_v21, 0 }
  0x91   : > { %215 = vmatpush.bf16.msra.mxu0 %v207_v22 }
  0x94   : > { %v285_v24 = vpop.permute.xlu1 %284 }
  0x95   : > { %216 = vmatpush.bf16.msra.mxu0 %v198_v25 }
  0x96   : > { %v283_v27 = vpop.permute.xlu0 %282  ;;  %v387_v38 = vpop.permute.xlu2 %386 }
  0x97   : > { %v288_v28 = vsel %vm286_vm3, %v283_v27, %v285_v24 }
  0x98   : > { %v294_v29 = vsel %vm205_vm1, %v288_v28, 0  ;;  %557 = vmatmul.msk.bf16.vlgmr.msra.gmra.mxu0 %vm201_vm4, %v548_v26 }
  0x99   : > { %302 = vmatpush.bf16.msra.mxu3 %v294_v29 }
  0x9c   : > { %v279_v32 = vpop.permute.xlu1 %278 }
  0x9d   : > { %v287_v33 = vsel %vm286_vm3, %v279_v32, %v281_v20 }
  0x9e   : > { %v247_v34 = vpop.permute.xlu0 %246  ;;  %303 = vmatpush.bf16.msra.mxu3 %v287_v33  ;;  %v351_v44 = vpop.permute.xlu2 %350 }
  0x9f   : > { %v253_v36 = vsel %vm252_vm0, %v245_v16, %v247_v34  ;;  %v238_v16 = vpop.f32.mrf.mxu1 }
  0xa0   : > { %269 = vmatpush.bf16.msra.mxu2 %v253_v36 }
  0xa1   : > { %562 = vmatmul.msk.bf16.vlgmr.msra.gmra.mxu3 %vm201_vm4, %v561_v35 }
  0xa3   : > { %560 = vmatmul.msk.bf16.vlgmr.msra.gmra.mxu2 %vm201_vm4, %v559_v37 }
  0xa4   : > { %v319_v39 = vpop.permute.xlu1 %318 }
  0xa6   : > { %v317_v40 = vpop.permute.xlu0 %316  ;;  %v383_v52 = vpop.permute.xlu2 %382 }
  0xa7   : > { %v322_v41 = vsel %vm320_vm5, %v317_v40, %v319_v39  ;;  %v240_v18 = vpop.f32.mrf.mxu1 }
  0xa8   : > { %v328_v42 = vsel %vm205_vm1, %v322_v41, 0 }
  0xa9   : > { %336 = vmatpush.bf16.msrb.mxu0 %v328_v42 }
  0xac   : > { %v385_v43 = vpop.permute.xlu1 %384 }
  0xad   : > { %v390_v45 = vsel %vm388_vm6, %v385_v43, %v387_v38 }
  0xae   : > { %v315_v46 = vpop.permute.xlu0 %314  ;;  %v396_v47 = vsel %vm205_vm1, %v390_v45, 0  ;;  %v453_v63 = vpop.permute.xlu2 %452 }
  0xaf   : > { %v321_v48 = vsel %vm320_vm5, %v313_v30, %v315_v46  ;;  %404 = vmatpush.bf16.msrb.mxu2 %v396_v47 }
  0xb0   : > { %337 = vmatpush.bf16.msrb.mxu0 %v321_v48 }
  0xb3   : > { %564 = vmatmul.msk.bf16.vlgmr.msrb.gmra.mxu0 %vm201_vm4, %v563_v49 }
  0xb4   : > { %v421_v50 = vpop.permute.xlu1 %420 }
  0xb6   : > { %v419_v51 = vpop.permute.xlu0 %418  ;;  %v349_v4 = vpop.permute.xlu2 %348 }
  0xb7   : > { %v424_v53 = vsel %vm422_vm7, %v419_v51, %v421_v50 }
  0xb8   : > { %v430_v54 = vsel %vm205_vm1, %v424_v53, 0 }
  0xb9   : > { %438 = vmatpush.bf16.msrb.mxu3 %v430_v54 }
  0xbc   : > { %v381_v56 = vpop.permute.xlu1 %380 }
  0xbd   : > { %v389_v58 = vsel %vm388_vm6, %v381_v56, %v383_v52 }
  0xbe   : > { %v353_v59 = vpop.permute.xlu0 %352  ;;  %405 = vmatpush.bf16.msrb.mxu2 %v389_v58  ;;  %v484_v39 = vpop.permute.xlu2 %483 }
  0xbf   : > { %v356_v61 = vsel %vm354_vm8, %v351_v44, %v353_v59 }
  0xc0   : > { %v362_v62 = vsel %vm205_vm1, %v356_v61, 0 }
  0xc1   : > { %370 = vmatpush.bf16.msrb.mxu1 %v362_v62  ;;  %568 = vmatmul.msk.bf16.vlgmr.msrb.gmra.mxu2 %vm201_vm4, %v567_v60 }
  0xc4   : > { %v417_v0 = vpop.permute.xlu1 %416 }
  0xc6   : > { %v415_v1 = vpop.permute.xlu0 %414 }
  0xc7   : > { %v423_v2 = vsel %vm422_vm7, %v415_v1, %v417_v0 }
  0xc8   : > { %439 = vmatpush.bf16.msrb.mxu3 %v423_v2 }
  0xcb   : > { %570 = vmatmul.msk.bf16.vlgmr.msrb.gmra.mxu3 %vm201_vm4, %v569_v3 }
  0xcc   : > { %v347_v5 = vpop.permute.xlu1 %346 }
  0xcd   : > { %v355_v6 = vsel %vm354_vm8, %v347_v5, %v349_v4 }
  0xce   : > { %v455_v7 = vpop.permute.xlu0 %454  ;;  %371 = vmatpush.bf16.msrb.mxu1 %v355_v6 }
  0xcf   : > { %v458_v9 = vsel %vm456_vm9, %v453_v63, %v455_v7 }
  0xd0   : > { %v464_v10 = vsel %vm205_vm1, %v458_v9, 0 }
  0xd1   : > { %566 = vmatmul.msk.bf16.vlgmr.msrb.gmra.mxu1 %vm201_vm4, %v565_v8  ;;  %472 = vmatpush.bf16.msra.mxu0 %v464_v10 }
  0xd4   : > { %v451_v11 = vpop.permute.xlu1 %450 }
  0xd6   : > { %v449_v12 = vpop.permute.xlu0 %448 }
  0xd7   : > { %v457_v13 = vsel %vm456_vm9, %v449_v12, %v451_v11 }
  0xd8   : > { %473 = vmatpush.bf16.msra.mxu0 %v457_v13 }
  0xdb   : > { %572 = vmatmul.msk.bf16.vlgmr.msra.gmra.mxu0 %vm201_vm4, %v571_v14 }
 0x115   : > { %v218_v15 = vpop.f32.mrf.mxu0 }
 0x116   : > { %v239_v25 = vadd.f32 %v238_v16, %v218_v15 }
 0x11d   : > { %v220_v17 = vpop.f32.mrf.mxu0 }
 0x124   : > { %v305_v19 = vpop.f32.mrf.mxu3 }
 0x126   : > { %v271_v20 = vpop.f32.mrf.mxu2 }
 0x127   : > { %v275_v27 = vadd.f32 %v271_v20, %v239_v25 }
 0x129   : > { %v309_v28 = vadd.f32 %v305_v19, %v275_v27 }
 0x12c   : > { %v307_v21 = vpop.f32.mrf.mxu3 }
 0x12e   : > { %v273_v22 = vpop.f32.mrf.mxu2 }
 0x130   : > { %v339_v23 = vpop.f32.mrf.mxu0 }
 0x131   : > { %v343_v30 = vadd.f32 %v339_v23, %v309_v28 }
 0x138   : > { %v341_v24 = vpop.f32.mrf.mxu0 }
 0x144   : > { %v407_v26 = vpop.f32.mrf.mxu2 }
 0x14c   : > { %v409_v29 = vpop.f32.mrf.mxu2 }
 0x14e   : > { %v373_v31 = vpop.f32.mrf.mxu1  ;;  %v441_v32 = vpop.f32.mrf.mxu3 }
 0x14f   : > { %v377_v33 = vadd.f32 %v373_v31, %v343_v30 }
 0x151   : > { %v411_v34 = vadd.f32 %v407_v26, %v377_v33 }
 0x153   : > { %v445_v37 = vadd.f32 %v441_v32, %v411_v34 }
 0x156   : > { %v375_v35 = vpop.f32.mrf.mxu1  ;;  %v443_v36 = vpop.f32.mrf.mxu3 }
 0x158   : > { %v475_v38 = vpop.f32.mrf.mxu0 }
 0x159   : > { %v479_v40 = vadd.f32 %v475_v38, %v445_v37 }
 0x15b   : > { %v486_v41 = vadd.f32 %v484_v39, %v479_v40 }
 0x15d   : > { %487 = vst [vmem:[%s168_s24] sm:$0xff] %v486_v41 }
 0x160   : > { %v477_v42 = vpop.f32.mrf.mxu0 }
 0x161 PF: > { %s13_s12 = sadd.s32 1, %s603_s12  }
 0x162   : > { %p10_p4 = scmp.ge.s32.totalorder %s13_s12, 4  }
 0x164   :  { %12 = sbr.rel (!%p10_p4) target bundleno = 1 (0x1), region = 70 }

</bundles_post_ra>
